<compile_context>
chip_gen: v7x
topology: tpu7x:2x2x1
jax: 0.10.0
libtpu: 0.0.40
codegen_flags: <defaults>
</compile_context>

<pallas_src>
import math

import jax
import jax.numpy as jnp
from jax.experimental import pallas as pl
from jax.experimental.pallas import tpu as pltpu

BN_EPS = 1e-5
_LANE = 128


def _round_up(x, m):
    return ((x + m - 1) // m) * m


def _dlmp_kernel(x_ref, w1_ref, w2_ref, w3_ref, wfc_ref, bfc_ref, o_ref):
    # x_ref:   (1, Bn*T, F)   bf16  flattened (sample, time) rows for Bn samples
    # w*_ref:  (in, out)      bf16  pre-transposed, BN scales folded, lane-padded
    # bfc_ref: (1, Cp)        f32
    # o_ref:   (1, Bn, Cp)    f32   sigmoid(max-over-time logits) per sample
    bn = o_ref.shape[1]
    rows = x_ref.shape[1]
    t = rows // bn

    x = x_ref[0]                                                      # (Bn*T, F) bf16

    h1 = jnp.dot(x, w1_ref[...], preferred_element_type=jnp.float32)  # conv1 (bn0*bn1 folded)
    a1 = jnp.maximum(h1, 0.0).astype(jnp.bfloat16)                    # relu (dropout = id in eval)

    h2 = jnp.dot(a1, w2_ref[...], preferred_element_type=jnp.float32)  # conv2 (bn2 folded)
    a2 = jnp.maximum(h2, 0.0).astype(jnp.bfloat16)

    h3 = jnp.dot(a2, w3_ref[...], preferred_element_type=jnp.float32)  # conv3 (bn3 folded)
    emb = jnp.maximum(h3, 0.0).astype(jnp.bfloat16)                    # (Bn*T, Hp)

    logits = jnp.dot(emb, wfc_ref[...], preferred_element_type=jnp.float32) + bfc_ref[...]

    # max over time first (sigmoid is monotonic), then C sigmoids per sample.
    lmax = jnp.max(logits.reshape(bn, t, logits.shape[-1]), axis=1)    # (Bn, Cp)
    o_ref[0] = jax.nn.sigmoid(lmax)


def decision_level_max_pooling(x, w1, w2, w3, w_fc, b_fc, *, target_rows=256):
    """x: (N, T, F) float32.  Weights in PyTorch layout:
       w1: (H, F), w2/w3: (H, H), w_fc: (C, H), b_fc: (C,)."""
    N, T, F = x.shape
    H = w1.shape[0]
    C = w_fc.shape[0]

    Hp = _round_up(H, _LANE)   # lane-dense hidden dim
    Cp = _round_up(C, _LANE)   # lane-dense class dim (unmasked output stores)

    s = 1.0 / math.sqrt(1.0 + BN_EPS)  # eval-mode BatchNorm scale

    def _pad2(a, shape):
        return jnp.zeros(shape, a.dtype).at[: a.shape[0], : a.shape[1]].set(a)

    # Pre-transpose to (in, out), fold BN scales, zero-pad lanes, cast to bf16.
    w1t = _pad2(jnp.transpose(w1).astype(jnp.float32) * (s * s), (F, Hp)).astype(jnp.bfloat16)
    w2t = _pad2(jnp.transpose(w2).astype(jnp.float32) * s, (Hp, Hp)).astype(jnp.bfloat16)
    w3t = _pad2(jnp.transpose(w3).astype(jnp.float32) * s, (Hp, Hp)).astype(jnp.bfloat16)
    wfct = _pad2(jnp.transpose(w_fc).astype(jnp.float32), (Hp, Cp)).astype(jnp.bfloat16)
    bfc = jnp.zeros((1, Cp), jnp.float32).at[0, :C].set(b_fc.astype(jnp.float32))

    # Batch Bn samples per grid step so the MXU sees >= target_rows rows.
    Bn = min(N, max(1, -(-target_rows // T)))
    N_pad = _round_up(N, Bn)
    NB = N_pad // Bn

    xb = x.astype(jnp.bfloat16)
    if N_pad > N:
        xb = jnp.concatenate(
            [xb, jnp.zeros((N_pad - N, T, F), jnp.bfloat16)], axis=0)
    x_rows = xb.reshape(NB, Bn * T, F)  # contiguous reshape, no data movement

    R = N_pad * T
    flops = 2 * R * (F * Hp + 2 * Hp * Hp + Hp * Cp)
    bytes_accessed = (
        R * F * 2                                    # bf16 input rows
        + (F * Hp + 2 * Hp * Hp + Hp * Cp) * 2       # bf16 weights
        + Cp * 4                                     # bias
        + N_pad * Cp * 4                             # f32 output
    )
    cost = pl.CostEstimate(
        flops=flops, transcendentals=N_pad * Cp, bytes_accessed=bytes_accessed)

    out = pl.pallas_call(
        _dlmp_kernel,
        out_shape=jax.ShapeDtypeStruct((NB, Bn, Cp), jnp.float32),
        grid=(NB,),
        in_specs=[
            pl.BlockSpec((1, Bn * T, F), lambda n: (n, 0, 0)),
            pl.BlockSpec((F, Hp), lambda n: (0, 0)),
            pl.BlockSpec((Hp, Hp), lambda n: (0, 0)),
            pl.BlockSpec((Hp, Hp), lambda n: (0, 0)),
            pl.BlockSpec((Hp, Cp), lambda n: (0, 0)),
            pl.BlockSpec((1, Cp), lambda n: (0, 0)),
        ],
        out_specs=pl.BlockSpec((1, Bn, Cp), lambda n: (n, 0, 0)),
        compiler_params=pltpu.CompilerParams(dimension_semantics=("parallel",)),
        cost_estimate=cost,
    )(x_rows, w1t, w2t, w3t, wfct, bfc)

    return out.reshape(N_pad, Cp)[:N, :C]  # strip sample + class padding


def _init_layer_weight(key, n_out, fan_in):
    # Mirrors init_layer(): uniform(-scale, scale), scale = sqrt(2/n) * sqrt(3)
    std = math.sqrt(2.0 / fan_in)
    scale = std * math.sqrt(3.0)
    return jax.random.uniform(key, (n_out, fan_in), jnp.float32, -scale, scale)


def _reference(x, w1, w2, w3, w_fc, b_fc):
    # Pure-JAX f32 reference of the PyTorch eval-mode forward.
    s = 1.0 / jnp.sqrt(1.0 + BN_EPS)
    a0 = x * s
    a1 = jnp.maximum(jnp.einsum("ntf,hf->nth", a0, w1) * s, 0.0)
    a2 = jnp.maximum(jnp.einsum("nth,gh->ntg", a1, w2) * s, 0.0)
    emb = jnp.maximum(jnp.einsum("nth,gh->ntg", a2, w3) * s, 0.0)
    logits = jnp.einsum("nth,ch->ntc", emb, w_fc) + b_fc[None, None, :]
    return jnp.max(jax.nn.sigmoid(logits), axis=1)


if __name__ == "__main__":
    # Small shapes consistent with the module's forward.
    N, T = 2, 16
    freq_bins, hidden_units, classes_num = 32, 32, 8

    key = jax.random.PRNGKey(0)
    kx, k1, k2, k3, kfc = jax.random.split(key, 5)

    x = jax.random.normal(kx, (N, T, freq_bins), dtype=jnp.float32)

    # Deterministic parameter init mirroring init_layer (1x1 convs: fan_in = in_channels).
    w1 = _init_layer_weight(k1, hidden_units, freq_bins)
    w2 = _init_layer_weight(k2, hidden_units, hidden_units)
    w3 = _init_layer_weight(k3, hidden_units, hidden_units)
    w_fc = _init_layer_weight(kfc, classes_num, hidden_units)
    b_fc = jnp.zeros((classes_num,), dtype=jnp.float32)  # init_layer fills bias with 0

    out = decision_level_max_pooling(x, w1, w2, w3, w_fc, b_fc)
    out = jax.block_until_ready(out)

    ref = _reference(x, w1, w2, w3, w_fc, b_fc)
    assert out.shape == (N, classes_num)
    # Kernel runs the matmul chain in bf16 (f32 accumulation); outputs are
    # sigmoid probabilities in [0,1], so compare with an absolute tolerance.
    assert jnp.allclose(out, ref, atol=3e-2, rtol=0.0), "mismatch vs pure-JAX reference"

    print("KERNEL_OK")
</pallas_src>

<mosaic_0001>
module attributes {stable_mosaic.version = 11 : i64} {
  func.func @_dlmp_kernel(%arg0: i32, %arg1: memref<1x32x32xbf16, #tpu.memory_space<vmem>>, %arg2: memref<32x128xbf16, #tpu.memory_space<vmem>>, %arg3: memref<128x128xbf16, #tpu.memory_space<vmem>>, %arg4: memref<128x128xbf16, #tpu.memory_space<vmem>>, %arg5: memref<128x128xbf16, #tpu.memory_space<vmem>>, %arg6: memref<1x128xf32, #tpu.memory_space<vmem>>, %arg7: memref<1x2x128xf32, #tpu.memory_space<vmem>>) attributes {dimension_semantics = [#tpu.dimension_semantics<parallel>], iteration_bounds = array<i64: 1>, scalar_prefetch = 0 : i64, scratch_operands = 0 : i64, tpu.core_type = #tpu.core_type<tc>, window_params = [{transform_indices = @transform_0, window_bounds = array<i64: 1, 32, 32>}, {pipeline_mode = #tpu.pipeline_mode<synchronous>, transform_indices = @transform_1, window_bounds = array<i64: 32, 128>}, {pipeline_mode = #tpu.pipeline_mode<synchronous>, transform_indices = @transform_2, window_bounds = array<i64: 128, 128>}, {pipeline_mode = #tpu.pipeline_mode<synchronous>, transform_indices = @transform_3, window_bounds = array<i64: 128, 128>}, {pipeline_mode = #tpu.pipeline_mode<synchronous>, transform_indices = @transform_4, window_bounds = array<i64: 128, 128>}, {pipeline_mode = #tpu.pipeline_mode<synchronous>, transform_indices = @transform_5, window_bounds = array<i64: 1, 128>}, {transform_indices = @transform_6, window_bounds = array<i64: 1, 2, 128>}]} {
    %c0 = arith.constant 0 : index
    %c0_0 = arith.constant 0 : index
    %c0_1 = arith.constant 0 : index
    %0 = vector.load %arg1[%c0, %c0_0, %c0_1] : memref<1x32x32xbf16, #tpu.memory_space<vmem>>, vector<1x32x32xbf16>
    %1 = vector.shape_cast %0 : vector<1x32x32xbf16> to vector<32x32xbf16>
    %c0_2 = arith.constant 0 : index
    %c0_3 = arith.constant 0 : index
    %2 = vector.load %arg2[%c0_2, %c0_3] : memref<32x128xbf16, #tpu.memory_space<vmem>>, vector<32x128xbf16>
    %cst = arith.constant dense<0.000000e+00> : vector<32x128xf32>
    %3 = tpu.matmul %1, %2, %cst {dimension_numbers = #tpu.dot_dimension_numbers<[1], [0], [0], [1], [0, 0, 1, 1], [], []>} : vector<32x32xbf16>, vector<32x128xbf16>, vector<32x128xf32> -> vector<32x128xf32>
    %cst_4 = arith.constant 0.000000e+00 : f32
    %4 = vector.broadcast %cst_4 : f32 to vector<32x128xf32>
    %5 = arith.maximumf %3, %4 : vector<32x128xf32>
    %6 = arith.truncf %5 : vector<32x128xf32> to vector<32x128xbf16>
    %c0_5 = arith.constant 0 : index
    %c0_6 = arith.constant 0 : index
    %7 = vector.load %arg3[%c0_5, %c0_6] : memref<128x128xbf16, #tpu.memory_space<vmem>>, vector<128x128xbf16>
    %cst_7 = arith.constant dense<0.000000e+00> : vector<32x128xf32>
    %8 = tpu.matmul %6, %7, %cst_7 {dimension_numbers = #tpu.dot_dimension_numbers<[1], [0], [0], [1], [0, 0, 1, 1], [], []>} : vector<32x128xbf16>, vector<128x128xbf16>, vector<32x128xf32> -> vector<32x128xf32>
    %cst_8 = arith.constant 0.000000e+00 : f32
    %9 = vector.broadcast %cst_8 : f32 to vector<32x128xf32>
    %10 = arith.maximumf %8, %9 : vector<32x128xf32>
    %11 = arith.truncf %10 : vector<32x128xf32> to vector<32x128xbf16>
    %c0_9 = arith.constant 0 : index
    %c0_10 = arith.constant 0 : index
    %12 = vector.load %arg4[%c0_9, %c0_10] : memref<128x128xbf16, #tpu.memory_space<vmem>>, vector<128x128xbf16>
    %cst_11 = arith.constant dense<0.000000e+00> : vector<32x128xf32>
    %13 = tpu.matmul %11, %12, %cst_11 {dimension_numbers = #tpu.dot_dimension_numbers<[1], [0], [0], [1], [0, 0, 1, 1], [], []>} : vector<32x128xbf16>, vector<128x128xbf16>, vector<32x128xf32> -> vector<32x128xf32>
    %cst_12 = arith.constant 0.000000e+00 : f32
    %14 = vector.broadcast %cst_12 : f32 to vector<32x128xf32>
    %15 = arith.maximumf %13, %14 : vector<32x128xf32>
    %16 = arith.truncf %15 : vector<32x128xf32> to vector<32x128xbf16>
    %c0_13 = arith.constant 0 : index
    %c0_14 = arith.constant 0 : index
    %17 = vector.load %arg5[%c0_13, %c0_14] : memref<128x128xbf16, #tpu.memory_space<vmem>>, vector<128x128xbf16>
    %cst_15 = arith.constant dense<0.000000e+00> : vector<32x128xf32>
    %18 = tpu.matmul %16, %17, %cst_15 {dimension_numbers = #tpu.dot_dimension_numbers<[1], [0], [0], [1], [0, 0, 1, 1], [], []>} : vector<32x128xbf16>, vector<128x128xbf16>, vector<32x128xf32> -> vector<32x128xf32>
    %c0_16 = arith.constant 0 : index
    %c0_17 = arith.constant 0 : index
    %19 = vector.load %arg6[%c0_16, %c0_17] : memref<1x128xf32, #tpu.memory_space<vmem>>, vector<1x128xf32>
    %20 = vector.broadcast %19 : vector<1x128xf32> to vector<32x128xf32>
    %21 = arith.addf %18, %20 : vector<32x128xf32>
    %22 = vector.shape_cast %21 : vector<32x128xf32> to vector<2x16x128xf32>
    %cst_18 = arith.constant dense<0xFF800000> : vector<2x128xf32>
    %23 = vector.multi_reduction <maximumf>, %22, %cst_18 [1] : vector<2x16x128xf32> to vector<2x128xf32>
    %24 = arith.negf %23 : vector<2x128xf32>
    %25 = math.exp %24 : vector<2x128xf32>
    %cst_19 = arith.constant 1.000000e+00 : f32
    %26 = vector.broadcast %cst_19 : f32 to vector<2x128xf32>
    %27 = arith.addf %26, %25 : vector<2x128xf32>
    %28 = arith.divf %26, %27 : vector<2x128xf32>
    %c0_20 = arith.constant 0 : index
    %c0_21 = arith.constant 0 : index
    %c0_22 = arith.constant 0 : index
    %29 = vector.load %arg7[%c0_20, %c0_21, %c0_22] : memref<1x2x128xf32, #tpu.memory_space<vmem>>, vector<1x2x128xf32>
    %30 = vector.shape_cast %29 : vector<1x2x128xf32> to vector<2x128xf32>
    %31 = vector.shape_cast %28 : vector<2x128xf32> to vector<1x2x128xf32>
    tpu.vector_store %arg7[%c0_20, %c0_21, %c0_22], %31 {strides = array<i32>} : memref<1x2x128xf32, #tpu.memory_space<vmem>>, vector<1x2x128xf32>,
    return
  }
  func.func @transform_0(%arg0: i32) -> (i32, i32, i32) {
    %c0_i32 = arith.constant 0 : i32
    %c0_i32_0 = arith.constant 0 : i32
    %c0_i32_1 = arith.constant 0 : i32
    return %arg0, %c0_i32, %c0_i32_0 : i32, i32, i32
  }
  func.func @transform_1(%arg0: i32) -> (i32, i32) {
    %c0_i32 = arith.constant 0 : i32
    %c0_i32_0 = arith.constant 0 : i32
    %c0_i32_1 = arith.constant 0 : i32
    return %c0_i32, %c0_i32_0 : i32, i32
  }
  func.func @transform_2(%arg0: i32) -> (i32, i32) {
    %c0_i32 = arith.constant 0 : i32
    %c0_i32_0 = arith.constant 0 : i32
    %c0_i32_1 = arith.constant 0 : i32
    return %c0_i32, %c0_i32_0 : i32, i32
  }
  func.func @transform_3(%arg0: i32) -> (i32, i32) {
    %c0_i32 = arith.constant 0 : i32
    %c0_i32_0 = arith.constant 0 : i32
    %c0_i32_1 = arith.constant 0 : i32
    return %c0_i32, %c0_i32_0 : i32, i32
  }
  func.func @transform_4(%arg0: i32) -> (i32, i32) {
    %c0_i32 = arith.constant 0 : i32
    %c0_i32_0 = arith.constant 0 : i32
    %c0_i32_1 = arith.constant 0 : i32
    return %c0_i32, %c0_i32_0 : i32, i32
  }
  func.func @transform_5(%arg0: i32) -> (i32, i32) {
    %c0_i32 = arith.constant 0 : i32
    %c0_i32_0 = arith.constant 0 : i32
    %c0_i32_1 = arith.constant 0 : i32
    return %c0_i32, %c0_i32_0 : i32, i32
  }
  func.func @transform_6(%arg0: i32) -> (i32, i32, i32) {
    %c0_i32 = arith.constant 0 : i32
    %c0_i32_0 = arith.constant 0 : i32
    %c0_i32_1 = arith.constant 0 : i32
    return %arg0, %c0_i32, %c0_i32_0 : i32, i32, i32
  }
}

</mosaic_0001>

<bundles_post_ra>
// kernel: tpu_custom_call.1
= control target key start
LH: loop header
LB: loop body
LE: loop exit
PB: predicated region body
PF: predicated region fallthrough
CT: control target
= control target key end

     0   :  { %11 = vsyncpa [#allocation3], 0  ;;  %s1058_s0 = inlined_call_operand.hbm [shape: bf16[1,32,32], index: 0, kind: input, shape index: {}]   ;;  %s1059_s1 = inlined_call_operand.hbm [shape: bf16[32,128], index: 1, kind: input, shape index: {}]   ;;  %s1060_s2 = inlined_call_operand.hbm [shape: bf16[128,128], index: 2, kind: input, shape index: {}]   ;;  %s1061_s3 = inlined_call_operand.hbm [shape: bf16[128,128], index: 3, kind: input, shape index: {}]   ;;  %s1062_s4 = inlined_call_operand.hbm [shape: bf16[128,128], index: 4, kind: input, shape index: {}]   ;;  %s1063_s5 = inlined_call_operand.vmem [shape: f32[1,128], index: 5, kind: input, shape index: {}]   ;;  %s1064_s6 = inlined_call_operand.hbm [shape: f32[1,2,128], index: 6, kind: output, shape index: {}]  }
   0x1   :  { %12 = vsyncpa [#allocation6], 0 }
   0x2   :  { %13 = vsyncpa [#allocation9], 0 }
   0x3   :  { %14 = vsyncpa [#allocation4], 0  ;;  %s911_s21 = smov [#allocation5]   ;;  %s912_s23 = smov [#allocation8]  }
   0x4   :  { %s32_s22 = sshll.u32 %s911_s21, 4  ;;  %s56_s24 = sshll.u32 %s912_s23, 4  ;;  %s33_s22 = int_to_ptr.vmem [resolvable:$true] %s32_s22  ;;  %s954_s24 = int_to_ptr.vmem [resolvable:$true] %s56_s24 }
   0x5   :  { %s771_s27 = scalar_lea.hbm %s1059_s1, 256 }
   0x6   :  { %p772_p0 = scmp.ne.s32.totalorder %s1059_s1, %s771_s27  ;;  %p775_p1 = scmp.lt.u32.totalorder %s771_s27, %s1059_s1 }
   0x8   :  { %p777_p2 = pnand %p775_p1, %p772_p0 }
   0xa   :  { %780 = shalt.err (!%p777_p2)
}
   0xb   :  { %s781_s8 = scalar_lea.vmem %s33_s22, 256  ;;  %p786_p4 = scmp.lt.s32.totalorder %s33_s22, %s33_s22 }
   0xc   :  { %p782_p3 = scmp.ne.s32.totalorder %s33_s22, %s781_s8  ;;  %p787_p5 = scmp.lt.s32.totalorder %s781_s8, %s781_s8 }
   0xe   :  { %p788_p6 = por %p787_p5, %p786_p4 }
  0x10   :  { %p789_p7 = pnand %p788_p6, %p782_p3 }
  0x12   :  { %792 = shalt.err (!%p789_p7)
}
  0x13   :  { %s913_s9 = smov 64   ;;  %s914_s10 = smov 4  }
  0x14   :  { %38 = dma.hbm_to_vmem [thread:$0]  %s1059_s1, 256, %s33_s22, [#allocation6], %s913_s9, %s913_s9, %s914_s10  }
  0x15   :  { %s793_s15 = scalar_lea.hbm %s1061_s3, 1024 }
  0x16   :  { %p794_p8 = scmp.ne.s32.totalorder %s1061_s3, %s793_s15  ;;  %p797_p9 = scmp.lt.u32.totalorder %s793_s15, %s1061_s3 }
  0x18   :  { %p799_p10 = pnand %p797_p9, %p794_p8 }
  0x1a   :  { %802 = shalt.err (!%p799_p10)
}
  0x1b   :  { %s803_s20 = scalar_lea.vmem %s954_s24, 1024  ;;  %p808_p12 = scmp.lt.s32.totalorder %s954_s24, %s954_s24 }
  0x1c   :  { %p804_p11 = scmp.ne.s32.totalorder %s954_s24, %s803_s20  ;;  %p809_p13 = scmp.lt.s32.totalorder %s803_s20, %s803_s20 }
  0x1e   :  { %p810_p0 = por %p809_p13, %p808_p12 }
  0x20   :  { %p811_p1 = pnand %p810_p0, %p804_p11 }
  0x22   :  { %814 = shalt.err (!%p811_p1)
}
  0x23   :  { %62 = dma.hbm_to_vmem [thread:$0]  %s1061_s3, 1024, %s954_s24, [#allocation9], %s913_s9, %s913_s9, %s914_s10  }
  0x24   :  { %s915_s22 = smov [#allocation2]   ;;  %s916_s25 = smov [#allocation7]  }
  0x25   :  { %s20_s23 = sshll.u32 %s915_s22, 4  ;;  %s44_s26 = sshll.u32 %s916_s25, 4  ;;  %s21_s23 = int_to_ptr.vmem [resolvable:$true] %s20_s23  ;;  %s991_s26 = int_to_ptr.vmem [resolvable:$true] %s44_s26 }
  0x26   :  { %s815_s29 = scalar_lea.hbm %s1058_s0, 256 }
  0x27   :  { %p816_p2 = scmp.ne.s32.totalorder %s1058_s0, %s815_s29  ;;  %p819_p3 = scmp.lt.u32.totalorder %s815_s29, %s1058_s0 }
  0x29   :  { %p821_p4 = pnand %p819_p3, %p816_p2 }
  0x2b   :  { %824 = shalt.err (!%p821_p4)
}
  0x2c   :  { %s825_s3 = scalar_lea.vmem %s21_s23, 256  ;;  %p830_p6 = scmp.lt.s32.totalorder %s21_s23, %s21_s23 }
  0x2d   :  { %p826_p5 = scmp.ne.s32.totalorder %s21_s23, %s825_s3  ;;  %p831_p7 = scmp.lt.s32.totalorder %s825_s3, %s825_s3 }
  0x2f   :  { %p832_p8 = por %p831_p7, %p830_p6 }
  0x31   :  { %p833_p9 = pnand %p832_p8, %p826_p5 }
  0x33   :  { %836 = shalt.err (!%p833_p9)
}
  0x34   :  { %26 = dma.hbm_to_vmem [thread:$0]  %s1058_s0, 256, %s21_s23, [#allocation3], %s913_s9, %s913_s9, %s914_s10  }
  0x35   :  { %s837_s15 = scalar_lea.hbm %s1060_s2, 1024 }
  0x36   :  { %p838_p10 = scmp.ne.s32.totalorder %s1060_s2, %s837_s15  ;;  %p841_p11 = scmp.lt.u32.totalorder %s837_s15, %s1060_s2 }
  0x38   :  { %p843_p12 = pnand %p841_p11, %p838_p10 }
  0x3a   :  { %846 = shalt.err (!%p843_p12)
}
  0x3b   :  { %s847_s20 = scalar_lea.vmem %s991_s26, 1024  ;;  %p852_p0 = scmp.lt.s32.totalorder %s991_s26, %s991_s26 }
  0x3c   :  { %p848_p13 = scmp.ne.s32.totalorder %s991_s26, %s847_s20  ;;  %p853_p1 = scmp.lt.s32.totalorder %s847_s20, %s847_s20 }
  0x3e   :  { %p854_p2 = por %p853_p1, %p852_p0 }
  0x40   :  { %p855_p3 = pnand %p854_p2, %p848_p13 }
  0x42   :  { %858 = shalt.err (!%p855_p3)
}
  0x43   :  { %50 = dma.hbm_to_vmem [thread:$0]  %s1060_s2, 1024, %s991_s26, [#allocation6], %s913_s9, %s913_s9, %s914_s10  }
  0x44   :  { %s917_s21 = smov [#allocation10]   ;;  %s859_s27 = scalar_lea.hbm %s1062_s4, 1024 }
  0x45   :  { %s68_s22 = sshll.u32 %s917_s21, 4  ;;  %p860_p4 = scmp.ne.s32.totalorder %s1062_s4, %s859_s27  ;;  %s69_s22 = int_to_ptr.vmem [resolvable:$true] %s68_s22 }
  0x46   :  { %p863_p5 = scmp.lt.u32.totalorder %s859_s27, %s1062_s4 }
  0x48   :  { %p865_p6 = pnand %p863_p5, %p860_p4 }
  0x4a   :  { %868 = shalt.err (!%p865_p6)
}
  0x4b   :  { %s869_s8 = scalar_lea.vmem %s69_s22, 1024  ;;  %p874_p8 = scmp.lt.s32.totalorder %s69_s22, %s69_s22 }
  0x4c   :  { %p870_p7 = scmp.ne.s32.totalorder %s69_s22, %s869_s8  ;;  %p875_p9 = scmp.lt.s32.totalorder %s869_s8, %s869_s8 }
  0x4e   :  { %p876_p10 = por %p875_p9, %p874_p8 }
  0x50   :  { %p877_p11 = pnand %p876_p10, %p870_p7 }
  0x52   :  { %880 = shalt.err (!%p877_p11)
}
  0x53   :  { %74 = dma.hbm_to_vmem [thread:$0]  %s1062_s4, 1024, %s69_s22, [#allocation9], %s913_s9, %s913_s9, %s914_s10  }
  0x54   :  { %903 = dma.done.wait [#allocation3], 256  }
  0x55   :  { %904 = vsyncadd [#allocation3], 4294967040 }
  0x56   :  { %905 = dma.done.wait [#allocation6], 1280  }
  0x57   :  { %906 = vsyncadd [#allocation6], 4294966016 }
  0x58   :  { %907 = dma.done.wait [#allocation9], 2048  }
  0x59   :  { %908 = vsyncadd [#allocation9], 4294965248  ;;  %v735_v0 = vld [vmem:[#allocation5] sm:$0xff]   ;;  %v736_v1 = vld [vmem:[#allocation5 + $0x8] sm:$0xff]   ;;  %vm123_vm0 = vcmask 261120   ;;  %vm571_vm1 = vcmask 1041409  }
  0x5a   :  { %659 = vmatprep.subr.bf16.mxu0 %v735_v0  ;;  %v737_v2 = vld [vmem:[#allocation2] sm:$0xff]   ;;  %v740_v4 = vld [vmem:[#allocation7 + $0x8] sm:$0xff]   ;;  %v741_v6 = vld [vmem:[#allocation7 + $0x10] sm:$0xff]  }
  0x5b   :  { %660 = vmatpush3.bf16.msra.mxu0 %v735_v0  ;;  %663 = vmatprep.mubr.msk.bf16.mxu0 %vm123_vm0, %v737_v2  ;;  %v739_v3 = vld [vmem:[#allocation7] sm:$0xff]   ;;  %v738_v5 = vld [vmem:[#allocation2 + $0x8] sm:$0xff]   ;;  %v742_v7 = vld [vmem:[#allocation7 + $0x18] sm:$0xff]  }
  0x5c   :  { %661 = vmatprep.subr.bf16.mxu0 %v736_v1  ;;  %667 = vmatprep.subr.bf16.mxu1 %v739_v3  ;;  %v743_v8 = vld [vmem:[#allocation7 + $0x20] sm:$0xff]   ;;  %v744_v9 = vld [vmem:[#allocation7 + $0x28] sm:$0xff]   ;;  %v745_v10 = vld [vmem:[#allocation7 + $0x30] sm:$0xff]  }
  0x5d   :  { %668 = vmatpush3.bf16.msra.mxu1 %v739_v3  ;;  %v746_v11 = vld [vmem:[#allocation7 + $0x38] sm:$0xff]   ;;  %v747_v12 = vld [vmem:[#allocation8] sm:$0xff]   ;;  %v748_v13 = vld [vmem:[#allocation8 + $0x8] sm:$0xff]  }
  0x5e   :  { %669 = vmatprep.subr.bf16.mxu1 %v740_v4  ;;  %v749_v14 = vld [vmem:[#allocation8 + $0x10] sm:$0xff]   ;;  %v750_v15 = vld [vmem:[#allocation8 + $0x18] sm:$0xff]   ;;  %v751_v16 = vld [vmem:[#allocation8 + $0x20] sm:$0xff]  }
  0x5f   :  { %662 = vmatpush3.bf16.msra.mxu0 %v736_v1  ;;  %v752_v17 = vld [vmem:[#allocation8 + $0x28] sm:$0xff]   ;;  %v753_v28 = vld [vmem:[#allocation8 + $0x30] sm:$0xff]   ;;  %v754_v29 = vld [vmem:[#allocation8 + $0x38] sm:$0xff]  }
  0x60   :  { %687 = vmatprep.subr.bf16.mxu0 %v747_v12  ;;  %v755_v30 = vld [vmem:[#allocation10] sm:$0xff]   ;;  %v756_v31 = vld [vmem:[#allocation10 + $0x8] sm:$0xff]   ;;  %v757_v32 = vld [vmem:[#allocation10 + $0x10] sm:$0xff]  }
  0x61   :  { %670 = vmatpush3.bf16.msra.mxu1 %v740_v4  ;;  %v758_v33 = vld [vmem:[#allocation10 + $0x18] sm:$0xff]   ;;  %v759_v34 = vld [vmem:[#allocation10 + $0x20] sm:$0xff]   ;;  %v760_v35 = vld [vmem:[#allocation10 + $0x28] sm:$0xff]  }
  0x62   :  { %664 = vmatmul.mubr.msk.bf16.vlgmr.msra.gmra.mrb[0].mxu0 %vm123_vm0, %v738_v5  ;;  %671 = vmatprep.subr.bf16.mxu1 %v741_v6  ;;  %v761_v46 = vld [vmem:[#allocation10 + $0x30] sm:$0xff]   ;;  %v762_v47 = vld [vmem:[#allocation10 + $0x38] sm:$0xff]   ;;  %v614_v59 = vld [vmem:[%s1063_s5] ss:$0 sm:$0xff]  ;;  %s918_s5 = smov [#allocation11]  }
  0x63   :  { %688 = vmatpush3.bf16.msra.mxu0 %v747_v12  ;;  %s581_s10 = sshll.u32 %s918_s5, 4  ;;  %s582_s10 = int_to_ptr.vmem [resolvable:$true] %s581_s10 }
  0x64   :  { %689 = vmatprep.subr.bf16.mxu0 %v748_v13  ;;  %s881_s11 = scalar_lea.vmem %s582_s10, 32  ;;  %p886_p13 = scmp.lt.s32.totalorder %s582_s10, %s582_s10 }
  0x65   :  { %672 = vmatpush3.bf16.msra.mxu1 %v741_v6  ;;  %p882_p12 = scmp.ne.s32.totalorder %s582_s10, %s881_s11  ;;  %p887_p0 = scmp.lt.s32.totalorder %s881_s11, %s881_s11 }
  0x66   :  { %673 = vmatprep.subr.bf16.mxu1 %v742_v7 }
  0x67   :  { %690 = vmatpush3.bf16.msra.mxu0 %v748_v13  ;;  %p888_p1 = por %p887_p0, %p886_p13 }
  0x68   :  { %691 = vmatprep.subr.bf16.mxu0 %v749_v14 }
  0x69   :  { %674 = vmatpush3.bf16.msra.mxu1 %v742_v7  ;;  %p889_p2 = pnand %p888_p1, %p882_p12 }
  0x6a   :  { %675 = vmatprep.subr.bf16.mxu1 %v743_v8 }
  0x6b   :  { %692 = vmatpush3.bf16.msra.mxu0 %v749_v14 }
  0x6c   :  { %693 = vmatprep.subr.bf16.mxu0 %v750_v15 }
  0x6d   :  { %676 = vmatpush3.bf16.msra.mxu1 %v743_v8 }
  0x6e   :  { %677 = vmatprep.subr.bf16.mxu1 %v744_v9 }
  0x6f   :  { %694 = vmatpush3.bf16.msra.mxu0 %v750_v15 }
  0x70   :  { %695 = vmatprep.subr.bf16.mxu0 %v751_v16 }
  0x71   :  { %678 = vmatpush3.bf16.msra.mxu1 %v744_v9 }
  0x72   :  { %679 = vmatprep.subr.bf16.mxu1 %v745_v10 }
  0x73   :  { %696 = vmatpush3.bf16.msra.mxu0 %v751_v16 }
  0x74   :  { %697 = vmatprep.subr.bf16.mxu0 %v752_v17 }
  0x75   :  { %680 = vmatpush3.bf16.msra.mxu1 %v745_v10 }
  0x76   :  { %681 = vmatprep.subr.bf16.mxu1 %v746_v11 }
  0x77   :  { %698 = vmatpush3.bf16.msra.mxu0 %v752_v17 }
  0x78   :  { %699 = vmatprep.subr.bf16.mxu0 %v753_v28 }
  0x79   :  { %682 = vmatpush3.bf16.msra.mxu1 %v746_v11 }
  0x7a   :  { %707 = vmatprep.subr.bf16.mxu1 %v755_v30 }
  0x7b   :  { %700 = vmatpush3.bf16.msra.mxu0 %v753_v28 }
  0x7c   :  { %701 = vmatprep.subr.bf16.mxu0 %v754_v29 }
  0x7f   :  { %702 = vmatpush3.bf16.msra.mxu0 %v754_v29 }
 0x135   :  { %v665_v18 = vpop.f32.mrb[0].mxu0 }
 0x136   :  { %v164_v19 = vpop.f32.mrb[1].mxu0  ;;  %v181_v21 = vmax.f32 %v665_v18, 0.0 }
 0x137   :  { %v666_v20 = vpop.f32.mrb[2].mxu0  ;;  %v179_v24 = vmax.f32 %v164_v19, 0.0 }
 0x138   :  { %v182_v22 = vmax.f32 %v666_v20, 0.0  ;;  %v167_v23 = vpop.f32.mrb[3].mxu0 }
 0x139   :  { %v180_v25 = vmax.f32 %v167_v23, 0.0 }
 0x13a   :  { %v184_v26 = vpack.c.bf16 %v182_v22, %v181_v21 }
 0x13b   :  { %v183_v27 = vpack.c.bf16 %v180_v25, %v179_v24 }
 0x13d   :  { %683 = vmatprep.mubr.bf16.mxu1 %v183_v27 }
 0x13e   :  { %684 = vmatmul.mubr.bf16.vlgmr.msra.gmra.mrb[0].mxu1 %v184_v26 }
 0x13f   :  { %708 = vmatpush3.bf16.msra.mxu1 %v755_v30 }
 0x140   :  { %709 = vmatprep.subr.bf16.mxu1 %v756_v31 }
 0x143   :  { %710 = vmatpush3.bf16.msra.mxu1 %v756_v31 }
 0x144   :  { %711 = vmatprep.subr.bf16.mxu1 %v757_v32 }
 0x147   :  { %712 = vmatpush3.bf16.msra.mxu1 %v757_v32 }
 0x148   :  { %713 = vmatprep.subr.bf16.mxu1 %v758_v33 }
 0x14b   :  { %714 = vmatpush3.bf16.msra.mxu1 %v758_v33 }
 0x14c   :  { %715 = vmatprep.subr.bf16.mxu1 %v759_v34 }
 0x14f   :  { %716 = vmatpush3.bf16.msra.mxu1 %v759_v34 }
 0x150   :  { %717 = vmatprep.subr.bf16.mxu1 %v760_v35 }
 0x153   :  { %718 = vmatpush3.bf16.msra.mxu1 %v760_v35 }
 0x154   :  { %719 = vmatprep.subr.bf16.mxu1 %v761_v46 }
 0x157   :  { %720 = vmatpush3.bf16.msra.mxu1 %v761_v46 }
 0x158   :  { %721 = vmatprep.subr.bf16.mxu1 %v762_v47 }
 0x15b   :  { %722 = vmatpush3.bf16.msra.mxu1 %v762_v47 }
 0x211   :  { %v685_v36 = vpop.f32.mrb[0].mxu1 }
 0x212   :  { %v283_v37 = vpop.f32.mrb[1].mxu1  ;;  %v300_v39 = vmax.f32 %v685_v36, 0.0 }
 0x213   :  { %v686_v38 = vpop.f32.mrb[2].mxu1  ;;  %v298_v42 = vmax.f32 %v283_v37, 0.0 }
 0x214   :  { %v301_v40 = vmax.f32 %v686_v38, 0.0  ;;  %v286_v41 = vpop.f32.mrb[3].mxu1 }
 0x215   :  { %v299_v43 = vmax.f32 %v286_v41, 0.0 }
 0x216   :  { %v303_v44 = vpack.c.bf16 %v301_v40, %v300_v39 }
 0x217   :  { %v302_v45 = vpack.c.bf16 %v299_v43, %v298_v42 }
 0x219   :  { %703 = vmatprep.mubr.bf16.mxu0 %v302_v45 }
 0x21a   :  { %704 = vmatmul.mubr.bf16.vlgmr.msra.gmra.mrb[4].mxu0 %v303_v44 }
 0x2ed   :  { %v705_v48 = vpop.f32.mrb[4].mxu0 }
 0x2ee   :  { %v402_v49 = vpop.f32.mrb[5].mxu0  ;;  %v419_v51 = vmax.f32 %v705_v48, 0.0 }
 0x2ef   :  { %v706_v50 = vpop.f32.mrb[6].mxu0  ;;  %v417_v54 = vmax.f32 %v402_v49, 0.0 }
 0x2f0   :  { %v420_v52 = vmax.f32 %v706_v50, 0.0  ;;  %v405_v53 = vpop.f32.mrb[7].mxu0 }
 0x2f1   :  { %v418_v55 = vmax.f32 %v405_v53, 0.0 }
 0x2f2   :  { %v422_v56 = vpack.c.bf16 %v420_v52, %v419_v51 }
 0x2f3   :  { %v421_v57 = vpack.c.bf16 %v418_v55, %v417_v54 }
 0x2f5   :  { %723 = vmatprep.mubr.bf16.mxu1 %v421_v57 }
 0x2f6   :  { %724 = vmatmul.mubr.bf16.vlgmr.msra.gmra.mrb[4].mxu1 %v422_v56 }
 0x3c9   :  { %v725_v58 = vpop.f32.mrb[4].mxu1 }
 0x3ca   :  { %v528_v60 = vpop.f32.mrb[5].mxu1  ;;  %v537_v62 = vadd.f32 %v725_v58, %v614_v59 }
 0x3cb   :  { %v726_v61 = vpop.f32.mrb[6].mxu1  ;;  %v529_v1 = vadd.f32 %v614_v59, %v528_v60 }
 0x3cc   :  { %v540_v63 = vadd.f32 %v726_v61, %v614_v59  ;;  %v531_v0 = vpop.f32.mrb[7].mxu1 }
 0x3cd   :  { %v532_v2 = vadd.f32 %v614_v59, %v531_v0 }
 0x3ce   :  { %v550_v3 = vmax.f32 %v537_v62, %v540_v63 }
 0x3cf   :  { %v543_v4 = vmax.f32 %v529_v1, %v532_v2 }
 0x3d0   :  { %v551_v5 = vrot.slane %v550_v3, 4 }
 0x3d1   :  { %v544_v6 = vrot.slane %v543_v4, 4 }
 0x3d2   :  { %v552_v7 = vmax.f32 %v550_v3, %v551_v5 }
 0x3d3   :  { %v545_v8 = vmax.f32 %v543_v4, %v544_v6 }
 0x3d4   :  { %v553_v9 = vrot.slane %v552_v7, 2 }
 0x3d5   :  { %v546_v10 = vrot.slane %v545_v8, 2 }
 0x3d6   :  { %v554_v11 = vmax.f32 %v552_v7, %v553_v9 }
 0x3d7   :  { %v547_v12 = vmax.f32 %v545_v8, %v546_v10 }
 0x3d8   :  { %v555_v13 = vrot.slane %v554_v11, 1 }
 0x3d9   :  { %v548_v14 = vrot.slane %v547_v12, 1 }
 0x3da   :  { %v556_v15 = vmax.f32 %v554_v11, %v555_v13 }
 0x3db   :  { %v549_v16 = vmax.f32 %v547_v12, %v548_v14 }
 0x3dc   :  { %v624_v17 = vmul.f32 -1.442695, %v556_v15 }
 0x3dd   :  { %v623_v18 = vmul.f32 -1.442695, %v549_v16 }
 0x3de   :  { %763 = vpow2.f32 %v624_v17 }
 0x3df   :  { %765 = vpow2.f32 %v623_v18 }
 0x3e8   :  { %v764_v19 = vpop.eup %763 }
 0x3e9   :  { %v766_v20 = vpop.eup %765  ;;  %v564_v21 = vadd.f32 1.0, %v764_v19 }
 0x3ea   :  { %v563_v22 = vadd.f32 1.0, %v766_v20 }
 0x3eb   :  { %767 = vrcp.f32 %v564_v21 }
 0x3ec   :  { %769 = vrcp.f32 %v563_v22 }
 0x3f5   :  { %v768_v23 = vpop.eup %767 }
 0x3f6   :  { %v770_v24 = vpop.eup %769 }
 0x3f7   :  { %v572_v25 = vsel %vm571_vm1, %v768_v23, %v770_v24 }
 0x3f8   :  { %574 = vst [vmem:[#allocation11] sm:$0x3] %v572_v25 }
 0x3f9   :  { %892 = shalt.err (!%p889_p2)
}
 0x3fa   :  { %s893_s12 = scalar_lea.hbm %s1064_s6, 32 }
 0x3fb   :  { %p894_p3 = scmp.ne.s32.totalorder %s1064_s6, %s893_s12  ;;  %p897_p4 = scmp.lt.u32.totalorder %s893_s12, %s1064_s6 }
 0x3fd   :  { %p899_p5 = pnand %p897_p4, %p894_p3 }
 0x3ff   :  { %902 = shalt.err (!%p899_p5)
}
 0x400   :  { %584 = dma.vmem_to_hbm [thread:$0]  %s582_s10, 32, %s1064_s6, [#allocation4]  }
 0x401   :  { %909 = dma.done.wait [#allocation4], 32  }
 0x402   :  { %910 = vsyncadd [#allocation4], 4294967264 }
 0x403   :  { %588 = vsyncpa [#allocation3], 1 }
 0x404   :  { %589 = vsyncpa [#allocation6], 1 }
 0x405   :  { %590 = vsyncpa [#allocation9], 1 }
 0x406   :  { %591 = vsyncpa [#allocation4], 1 }

</bundles_post_ra>
